<compile_context>
chip_gen: v6e
topology: v6e:2x2x1
jax: 0.10.0
libtpu: 0.0.40
codegen_flags: <defaults>
</compile_context>

<pallas_src>
import functools

import jax
import jax.numpy as jnp
from jax import lax
from jax.experimental import pallas as pl
from jax.experimental.pallas import tpu as pltpu

LANES = 128
SUBLANES = 8
TILE = SUBLANES * LANES                     # 1024 elements = one f32 vreg tile
_VMEM_INPUT_BUDGET = 16 * 1024 * 1024       # 2 inputs x 2 buffers per step
_VMEM_LIMIT_BYTES = 32 << 20                # explicit scoped-VMEM limit


def _num_tensorcores():
    """Best-effort TensorCore count (2 on v7x, 1 on v5e/v6e)."""
    try:
        info = pltpu.get_tpu_info()
        for name in ("num_cores", "core_count", "tensorcore_count",
                     "num_tensorcores", "cores_per_chip", "num_cores_per_chip"):
            v = getattr(info, name, None)
            if isinstance(v, int) and v >= 1:
                return v
    except Exception:
        pass
    # Unknown: default to 2. On 1-TC chips the extra "parallel" split is a
    # no-op grid reshuffle (its only cost is one skipped duplicate block
    # when n_blocks is odd).
    return 2


def _dice_kernel(x_ref, t_ref, acc_ref, *, groups, block_groups,
                 blocks_per_split, full_blocks, nch, has_partial, has_clamped):
    i = pl.program_id(1)

    @pl.when(i == 0)
    def _init():
        acc_ref[...] = jnp.zeros_like(acc_ref)

    def _reduce(v):
        # Two-stage reduction over the leading (groups) axis: nch independent
        # accumulation chains (VALU throughput), then a short final collapse.
        # Splitting the leading dim is layout-neutral (minor (8,128) tile
        # untouched), so the reshape is free.
        if nch > 1:
            v = v.reshape(block_groups // nch, nch, SUBLANES, LANES)
            v = jnp.sum(v, axis=0)              # (nch, 8, 128)
        return jnp.sum(v, axis=0)               # (8, 128)

    def _accumulate(mask_from=None):
        x = x_ref[...].astype(jnp.float32)
        t = t_ref[...].astype(jnp.float32)
        if mask_from is not None:
            # Mask BEFORE any arithmetic: rows past `groups` in the partial
            # block hold whatever stale bits were in the VMEM input buffer.
            gid = mask_from * block_groups + lax.broadcasted_iota(
                jnp.int32, x.shape, 0)
            valid = gid < groups
            x = jnp.where(valid, x, 0.0)
            t = jnp.where(valid, t, 0.0)
        acc_ref[0, 0, :, :] += _reduce(x * t)   # partial sum(x * t)
        acc_ref[0, 1, :, :] += _reduce(x + t)   # partial sum(x) + sum(t)

    if not (has_partial or has_clamped):
        # Hot path: every block is fully valid -> pure load / mul / add.
        _accumulate()
        return

    blk = pl.program_id(0) * blocks_per_split + i

    @pl.when(blk < full_blocks)
    def _full():
        _accumulate()

    if has_partial:
        @pl.when(blk == full_blocks)
        def _partial():
            _accumulate(mask_from=full_blocks)
    # blk > full_blocks: clamped duplicate block from the split -> skip.


def dice_loss(inputs, targets, smooth=1.0, *, block_groups=None, splits=None):
    """Pallas implementation of DiceLoss.forward (matches PyTorch module)."""
    x = jnp.reshape(inputs, (-1,))
    t = jnp.reshape(targets, (-1,))
    n = x.shape[0]

    tail_inter = jnp.float32(0.0)
    tail_sum = jnp.float32(0.0)
    n_main = (n // TILE) * TILE
    if n_main == 0:
        # Entire input is smaller than one (8,128) tile: pad it up (tiny,
        # sum-neutral copy) so the kernel still gets one full group.
        x_main = jnp.pad(x, (0, TILE - n))
        t_main = jnp.pad(t, (0, TILE - n))
        n_main = TILE
    elif n_main == n:
        x_main, t_main = x, t
    else:
        # Ragged tail (< 1024 elements): reduce it with a tiny jnp.sum in the
        # wrapper; no full-array jnp.pad copy.
        # TODO(synk): a fully zero-copy ragged path (avoiding the prefix
        # slice) would need a manual-DMA kernel on memory_space=pl.ANY.
        x_main, t_main = x[:n_main], t[:n_main]
        xt = x[n_main:].astype(jnp.float32)
        tt = t[n_main:].astype(jnp.float32)
        tail_inter = jnp.sum(xt * tt)
        tail_sum = jnp.sum(xt) + jnp.sum(tt)

    groups = n_main // TILE
    x3 = x_main.reshape(groups, SUBLANES, LANES)   # free reshape, native dtype
    t3 = t_main.reshape(groups, SUBLANES, LANES)

    # Generation-aware tile sizing: keep 2 inputs x 2 pipeline buffers within
    # the 16 MiB budget (1024 groups = 4 MiB/input/step for f32, 2048 for
    # bf16).  Fits v5e (with the explicit 32 MiB limit below), v6e and v7x
    # (64 MiB physical VMEM per TC) comfortably.
    per_group_bytes = TILE * (jnp.dtype(x3.dtype).itemsize +
                              jnp.dtype(t3.dtype).itemsize)
    if block_groups is None:
        block_groups = max(8, (_VMEM_INPUT_BUDGET // 2) // per_group_bytes)
        block_groups -= block_groups % 8
    block_groups = max(1, min(block_groups, groups))

    # Number of independent accumulation chains (must divide block_groups).
    nch = 1
    for c in (8, 4, 2):
        if block_groups % c == 0:
            nch = c
            break

    n_blocks = pl.cdiv(groups, block_groups)
    if splits is None:
        splits = _num_tensorcores()
    splits = max(1, min(splits, n_blocks))
    bps = pl.cdiv(n_blocks, splits)

    full_blocks = groups // block_groups           # fully-valid blocks
    has_partial = (groups % block_groups) != 0     # one masked tail block
    has_clamped = (splits * bps) > n_blocks        # duplicate blocks, skipped

    def in_idx(c, i):
        # Clamp so an over-run block of the last split stays in bounds; its
        # compute is skipped inside the kernel.
        return (jnp.minimum(c * bps + i, n_blocks - 1), 0, 0)

    kernel = functools.partial(
        _dice_kernel, groups=groups, block_groups=block_groups,
        blocks_per_split=bps, full_blocks=full_blocks, nch=nch,
        has_partial=has_partial, has_clamped=has_clamped)

    bytes_in = n_main * (jnp.dtype(x3.dtype).itemsize +
                         jnp.dtype(t3.dtype).itemsize)
    partials = pl.pallas_call(
        kernel,
        out_shape=jax.ShapeDtypeStruct((splits, 2, SUBLANES, LANES),
                                       jnp.float32),
        grid_spec=pltpu.PrefetchScalarGridSpec(
            num_scalar_prefetch=0,
            grid=(splits, bps),
            in_specs=[
                pl.BlockSpec((block_groups, SUBLANES, LANES), in_idx),
                pl.BlockSpec((block_groups, SUBLANES, LANES), in_idx),
            ],
            out_specs=pl.BlockSpec((1, 2, SUBLANES, LANES),
                                   lambda c, i: (c, 0, 0, 0)),
        ),
        compiler_params=pltpu.CompilerParams(
            dimension_semantics=("parallel", "arbitrary"),
            vmem_limit_bytes=_VMEM_LIMIT_BYTES,
        ),
        cost_estimate=pl.CostEstimate(
            flops=4 * n_main,
            transcendentals=0,
            bytes_accessed=bytes_in + splits * 2 * TILE * 4,
        ),
    )(x3, t3)

    inter = jnp.sum(partials[:, 0]) + tail_inter
    denom = jnp.sum(partials[:, 1]) + tail_sum
    dice = (2.0 * inter + smooth) / (denom + smooth)
    return 1.0 - dice


def dice_loss_ref(inputs, targets, smooth=1.0):
    x = jnp.reshape(inputs, (-1,)).astype(jnp.float32)
    t = jnp.reshape(targets, (-1,)).astype(jnp.float32)
    inter = jnp.sum(x * t)
    dice = (2.0 * inter + smooth) / (jnp.sum(x) + jnp.sum(t) + smooth)
    return 1.0 - dice


if __name__ == "__main__":
    key = jax.random.PRNGKey(0)

    # Primary case: segmentation-style (batch, channels, H, W).
    k1, k2 = jax.random.split(key)
    inputs = jax.nn.sigmoid(jax.random.normal(k1, (2, 4, 16, 16), jnp.float32))
    targets = (jax.random.uniform(k2, (2, 4, 16, 16)) > 0.5).astype(jnp.float32)
    loss = jax.block_until_ready(dice_loss(inputs, targets, smooth=1.0))
    ref = dice_loss_ref(inputs, targets, smooth=1.0)
    assert jnp.allclose(loss, ref, atol=1e-5, rtol=1e-5), (loss, ref)

    # Ragged case: exercises the wrapper-side tail reduction (no jnp.pad).
    k3, k4 = jax.random.split(k1)
    inputs2 = jax.nn.sigmoid(jax.random.normal(k3, (2, 3, 17, 19), jnp.float32))
    targets2 = (jax.random.uniform(k4, (2, 3, 17, 19)) > 0.5).astype(jnp.float32)
    loss2 = jax.block_until_ready(dice_loss(inputs2, targets2, smooth=1.0))
    ref2 = dice_loss_ref(inputs2, targets2, smooth=1.0)
    assert jnp.allclose(loss2, ref2, atol=1e-5, rtol=1e-5), (loss2, ref2)

    # Larger single-block case (groups not a multiple of 8 -> nch=4 path).
    k5, k6 = jax.random.split(k2)
    inputs3 = jax.nn.sigmoid(
        jax.random.normal(k5, (1, 8, 300, 128), jnp.float32))
    targets3 = (jax.random.uniform(k6, (1, 8, 300, 128)) > 0.5).astype(
        jnp.float32)
    loss3 = jax.block_until_ready(dice_loss(inputs3, targets3, smooth=1.0))
    ref3 = dice_loss_ref(inputs3, targets3, smooth=1.0)
    assert jnp.allclose(loss3, ref3, atol=1e-4, rtol=1e-4), (loss3, ref3)

    # Forced small blocks + 2-way split: exercises the gated partial-tail
    # masking and the skipped clamped-duplicate block.
    loss3b = jax.block_until_ready(
        dice_loss(inputs3, targets3, smooth=1.0, block_groups=64, splits=2))
    assert jnp.allclose(loss3b, ref3, atol=1e-4, rtol=1e-4), (loss3b, ref3)

    print("KERNEL_OK")
</pallas_src>

<mosaic_0001>
module attributes {stable_mosaic.version = 11 : i64} {
  func.func @_dice_kernel(%arg0: i32, %arg1: i32, %arg2: memref<2x8x128xf32, #tpu.memory_space<vmem>>, %arg3: memref<2x8x128xf32, #tpu.memory_space<vmem>>, %arg4: memref<1x2x8x128xf32, #tpu.memory_space<vmem>>) attributes {dimension_semantics = [#tpu.dimension_semantics<parallel>, #tpu.dimension_semantics<arbitrary>], iteration_bounds = array<i64: 1, 1>, scalar_prefetch = 0 : i64, scratch_operands = 0 : i64, tpu.core_type = #tpu.core_type<tc>, window_params = [{transform_indices = @transform_0, window_bounds = array<i64: 2, 8, 128>}, {transform_indices = @transform_1, window_bounds = array<i64: 2, 8, 128>}, {transform_indices = @transform_2, window_bounds = array<i64: 1, 2, 8, 128>}]} {
    %c0_i32 = arith.constant 0 : i32
    %0 = arith.cmpi eq, %arg1, %c0_i32 : i32
    %1 = arith.extui %0 : i1 to i32
    %c0_i32_0 = arith.constant 0 : i32
    %2 = arith.cmpi ne, %1, %c0_i32_0 : i32
    scf.if %2 {
      %cst_24 = arith.constant 0.000000e+00 : f32
      %25 = vector.broadcast %cst_24 : f32 to vector<1x2x8x128xf32>
      %c0_25 = arith.constant 0 : index
      %c0_26 = arith.constant 0 : index
      %c0_27 = arith.constant 0 : index
      %c0_28 = arith.constant 0 : index
      %26 = vector.load %arg4[%c0_25, %c0_26, %c0_27, %c0_28] : memref<1x2x8x128xf32, #tpu.memory_space<vmem>>, vector<1x2x8x128xf32>
      tpu.vector_store %arg4[%c0_25, %c0_26, %c0_27, %c0_28], %25 {strides = array<i32>} : memref<1x2x8x128xf32, #tpu.memory_space<vmem>>, vector<1x2x8x128xf32>,
    } else {
    }
    %c0 = arith.constant 0 : index
    %c0_1 = arith.constant 0 : index
    %c0_2 = arith.constant 0 : index
    %3 = vector.load %arg2[%c0, %c0_1, %c0_2] : memref<2x8x128xf32, #tpu.memory_space<vmem>>, vector<2x8x128xf32>
    %c0_3 = arith.constant 0 : index
    %c0_4 = arith.constant 0 : index
    %c0_5 = arith.constant 0 : index
    %4 = vector.load %arg3[%c0_3, %c0_4, %c0_5] : memref<2x8x128xf32, #tpu.memory_space<vmem>>, vector<2x8x128xf32>
    %c0_6 = arith.constant 0 : index
    %c0_7 = arith.constant 0 : index
    %c0_8 = arith.constant 0 : index
    %c0_9 = arith.constant 0 : index
    %5 = vector.load %arg4[%c0_6, %c0_7, %c0_8, %c0_9] : memref<1x2x8x128xf32, #tpu.memory_space<vmem>>, vector<1x1x8x128xf32>
    %6 = vector.shape_cast %5 : vector<1x1x8x128xf32> to vector<8x128xf32>
    %7 = arith.mulf %3, %4 : vector<2x8x128xf32>
    %8 = vector.shape_cast %7 : vector<2x8x128xf32> to vector<1x2x8x128xf32>
    %cst = arith.constant dense<0.000000e+00> : vector<2x8x128xf32>
    %9 = vector.multi_reduction <add>, %8, %cst [0] : vector<1x2x8x128xf32> to vector<2x8x128xf32>
    %cst_10 = arith.constant dense<0.000000e+00> : vector<8x128xf32>
    %10 = vector.multi_reduction <add>, %9, %cst_10 [0] : vector<2x8x128xf32> to vector<8x128xf32>
    %11 = arith.addf %6, %10 : vector<8x128xf32>
    %c0_11 = arith.constant 0 : index
    %c0_12 = arith.constant 0 : index
    %c0_13 = arith.constant 0 : index
    %c0_14 = arith.constant 0 : index
    %12 = vector.load %arg4[%c0_11, %c0_12, %c0_13, %c0_14] : memref<1x2x8x128xf32, #tpu.memory_space<vmem>>, vector<1x1x8x128xf32>
    %13 = vector.shape_cast %12 : vector<1x1x8x128xf32> to vector<8x128xf32>
    %14 = vector.shape_cast %11 : vector<8x128xf32> to vector<1x1x8x128xf32>
    tpu.vector_store %arg4[%c0_11, %c0_12, %c0_13, %c0_14], %14 {strides = array<i32>} : memref<1x2x8x128xf32, #tpu.memory_space<vmem>>, vector<1x1x8x128xf32>,
    %c0_15 = arith.constant 0 : index
    %c1 = arith.constant 1 : index
    %c0_16 = arith.constant 0 : index
    %c0_17 = arith.constant 0 : index
    %15 = vector.load %arg4[%c0_15, %c1, %c0_16, %c0_17] : memref<1x2x8x128xf32, #tpu.memory_space<vmem>>, vector<1x1x8x128xf32>
    %16 = vector.shape_cast %15 : vector<1x1x8x128xf32> to vector<8x128xf32>
    %17 = arith.addf %3, %4 : vector<2x8x128xf32>
    %18 = vector.shape_cast %17 : vector<2x8x128xf32> to vector<1x2x8x128xf32>
    %cst_18 = arith.constant dense<0.000000e+00> : vector<2x8x128xf32>
    %19 = vector.multi_reduction <add>, %18, %cst_18 [0] : vector<1x2x8x128xf32> to vector<2x8x128xf32>
    %cst_19 = arith.constant dense<0.000000e+00> : vector<8x128xf32>
    %20 = vector.multi_reduction <add>, %19, %cst_19 [0] : vector<2x8x128xf32> to vector<8x128xf32>
    %21 = arith.addf %16, %20 : vector<8x128xf32>
    %c0_20 = arith.constant 0 : index
    %c1_21 = arith.constant 1 : index
    %c0_22 = arith.constant 0 : index
    %c0_23 = arith.constant 0 : index
    %22 = vector.load %arg4[%c0_20, %c1_21, %c0_22, %c0_23] : memref<1x2x8x128xf32, #tpu.memory_space<vmem>>, vector<1x1x8x128xf32>
    %23 = vector.shape_cast %22 : vector<1x1x8x128xf32> to vector<8x128xf32>
    %24 = vector.shape_cast %21 : vector<8x128xf32> to vector<1x1x8x128xf32>
    tpu.vector_store %arg4[%c0_20, %c1_21, %c0_22, %c0_23], %24 {strides = array<i32>} : memref<1x2x8x128xf32, #tpu.memory_space<vmem>>, vector<1x1x8x128xf32>,
    return
  }
  func.func @transform_0(%arg0: i32, %arg1: i32) -> (i32, i32, i32) {
    %c1_i32 = arith.constant 1 : i32
    %0 = arith.muli %arg0, %c1_i32 : i32
    %1 = arith.addi %0, %arg1 : i32
    %c0_i32 = arith.constant 0 : i32
    %2 = arith.minsi %1, %c0_i32 : i32
    %c0_i32_0 = arith.constant 0 : i32
    %c0_i32_1 = arith.constant 0 : i32
    %c0_i32_2 = arith.constant 0 : i32
    return %2, %c0_i32_0, %c0_i32_1 : i32, i32, i32
  }
  func.func @transform_1(%arg0: i32, %arg1: i32) -> (i32, i32, i32) {
    %c1_i32 = arith.constant 1 : i32
    %0 = arith.muli %arg0, %c1_i32 : i32
    %1 = arith.addi %0, %arg1 : i32
    %c0_i32 = arith.constant 0 : i32
    %2 = arith.minsi %1, %c0_i32 : i32
    %c0_i32_0 = arith.constant 0 : i32
    %c0_i32_1 = arith.constant 0 : i32
    %c0_i32_2 = arith.constant 0 : i32
    return %2, %c0_i32_0, %c0_i32_1 : i32, i32, i32
  }
  func.func @transform_2(%arg0: i32, %arg1: i32) -> (i32, i32, i32, i32) {
    %c0_i32 = arith.constant 0 : i32
    %c0_i32_0 = arith.constant 0 : i32
    %c0_i32_1 = arith.constant 0 : i32
    %c0_i32_2 = arith.constant 0 : i32
    return %arg0, %c0_i32, %c0_i32_0, %c0_i32_1 : i32, i32, i32, i32
  }
}

</mosaic_0001>

<bundles_post_ra>
// kernel: tpu_custom_call.1
= control target key start
LH: loop header
LB: loop body
LE: loop exit
PB: predicated region body
PF: predicated region fallthrough
CT: control target
= control target key end

     0   :  { %7 = vsyncpa [#allocation3], 0  ;;  %s219_s0 = inlined_call_operand.hbm [shape: f32[2,8,128], index: 0, kind: input, shape index: {}]   ;;  %s220_s1 = inlined_call_operand.hbm [shape: f32[2,8,128], index: 1, kind: input, shape index: {}]   ;;  %s221_s2 = inlined_call_operand.hbm [shape: f32[1,2,8,128], index: 2, kind: output, shape index: {}]  }
   0x1   :  { %8 = vsyncpa [#allocation6], 0 }
   0x2   :  { %9 = vsyncpa [#allocation4], 0  ;;  %s181_s9 = smov [#allocation2]  }
   0x3   :  { %s21_s10 = sshll.u32 %s181_s9, 4  ;;  %s22_s10 = int_to_ptr.vmem [resolvable:$true] %s21_s10 }
   0x4   :  { %s123_s11 = scalar_lea.vmem %s22_s10, 256  ;;  %p128_p1 = scmp.lt.s32.totalorder %s22_s10, %s22_s10 }
   0x5   :  { %p124_p0 = scmp.ne.s32.totalorder %s22_s10, %s123_s11  ;;  %p129_p2 = scmp.lt.s32.totalorder %s123_s11, %s123_s11 }
   0x7   :  { %p130_p3 = por %p129_p2, %p128_p1 }
   0x9   :  { %p131_p4 = pnand %p130_p3, %p124_p0 }
   0xb   :  { %134 = shalt.err (!%p131_p4)
}
   0xc   :  { %s182_s12 = smov 128   ;;  %s183_s13 = smov 8  }
   0xd   :  { %27 = dma.hbm_to_vmem [thread:$0]  %s219_s0, 256, %s22_s10, [#allocation3], %s182_s12, %s182_s12, %s183_s13  }
   0xe   :  { %s184_s16 = smov [#allocation5]  }
   0xf   :  { %s39_s17 = sshll.u32 %s184_s16, 4  ;;  %s40_s17 = int_to_ptr.vmem [resolvable:$true] %s39_s17 }
  0x10   :  { %s143_s18 = scalar_lea.vmem %s40_s17, 256  ;;  %p148_p6 = scmp.lt.s32.totalorder %s40_s17, %s40_s17 }
  0x11   :  { %p144_p5 = scmp.ne.s32.totalorder %s40_s17, %s143_s18  ;;  %p149_p7 = scmp.lt.s32.totalorder %s143_s18, %s143_s18 }
  0x13   :  { %p150_p8 = por %p149_p7, %p148_p6 }
  0x15   :  { %p151_p9 = pnand %p150_p8, %p144_p5 }
  0x17   :  { %154 = shalt.err (!%p151_p9)
}
  0x18   :  { %45 = dma.hbm_to_vmem [thread:$0]  %s220_s1, 256, %s40_s17, [#allocation6], %s182_s12, %s182_s12, %s183_s13  }
  0x19   :  { %175 = dma.done.wait [#allocation3], 256  }
  0x1a   :  { %176 = vsyncadd [#allocation3], 4294967040 }
  0x1b   :  { %177 = dma.done.wait [#allocation6], 256  }
  0x1c   :  { %178 = vsyncadd [#allocation6], 4294967040  ;;  %v66_v0 = vld [vmem:[#allocation2] sm:$0xff]  ;;  %v67_v1 = vld [vmem:[#allocation2 + $0x8] sm:$0xff]  ;;  %s185_s0 = smov [#allocation7]  }
  0x1d   :  { %v68_v2 = vld [vmem:[#allocation5] sm:$0xff]  ;;  %v69_v3 = vld [vmem:[#allocation5 + $0x8] sm:$0xff]  ;;  %s92_s21 = sshll.u32 %s185_s0, 4  ;;  %s93_s21 = int_to_ptr.vmem [resolvable:$true] %s92_s21 }
  0x1e   :  { %v71_v4 = vmul.f32 %v68_v2, %v66_v0  ;;  %v80_v5 = vadd.f32 %v68_v2, %v66_v0  ;;  %v72_v6 = vmul.f32 %v69_v3, %v67_v1  ;;  %v81_v7 = vadd.f32 %v69_v3, %v67_v1  ;;  %s155_s1 = scalar_lea.vmem %s93_s21, 256  ;;  %p160_p11 = scmp.lt.s32.totalorder %s93_s21, %s93_s21 }
  0x1f   :  { %p156_p10 = scmp.ne.s32.totalorder %s93_s21, %s155_s1  ;;  %p161_p12 = scmp.lt.s32.totalorder %s155_s1, %s155_s1 }
  0x20   :  { %v75_v8 = vadd.f32 %v72_v6, %v71_v4  ;;  %v84_v9 = vadd.f32 %v81_v7, %v80_v5 }
  0x21   :  { %p162_p13 = por %p161_p12, %p160_p11 }
  0x22   :  { %77 = vst [vmem:[#allocation7] sm:$0xff] %v75_v8  ;;  %86 = vst [vmem:[#allocation7 + $0x8] sm:$0xff] %v84_v9 }
  0x23   :  { %p163_p0 = pnand %p162_p13, %p156_p10 }
  0x25   :  { %166 = shalt.err (!%p163_p0)
}
  0x26   :  { %98 = dma.vmem_to_hbm [thread:$0]  %s93_s21, 256, %s221_s2, [#allocation4], %s182_s12, %s182_s12, %s183_s13  }
  0x27   :  { %179 = dma.done.wait [#allocation4], 256  }
  0x28   :  { %180 = vsyncadd [#allocation4], 4294967040 }
  0x29   :  { %102 = vsyncpa [#allocation3], 1 }
  0x2a   :  { %103 = vsyncpa [#allocation6], 1 }
  0x2b   :  { %104 = vsyncpa [#allocation4], 1 }

</bundles_post_ra>
